<compile_context>
chip_gen: v6e
topology: v6e:2x2x1
jax: 0.10.0
libtpu: 0.0.40
codegen_flags: <defaults>
</compile_context>

<pallas_src>
import jax
import jax.numpy as jnp
import numpy as np
from jax.experimental import pallas as pl
from jax.experimental.pallas import tpu as pltpu

# ---- static module configuration (consistent with the nn.Module) ----
N, CIN, H, W = 2, 4, 16, 16          # batch, in_channels, spatial
COUT, KH, KW = 8, 3, 3               # out_channels, kernel_size
PH, PW = KH // 2, KW // 2            # padding='same', stride=1, dilation=1
HP, WP = H // 2, W // 2              # MaxPool2d(kernel_size=2, stride=2)
EPS = 1e-5                           # BatchNorm2d eps
K = KH * KW * CIN                    # 36 contraction dim
S = N * H * W                        # 512 conv-output positions (lanes)
Q = N * HP * WP                      # 128 pooled positions (lanes)


def cnn_block_kernel(p_ref, w_ref, b_ref, o_ref):
    # p_ref: (K, S) = (36, 512) bf16 patch matrix, lane order (dh, dw, n, hp, wp)
    # w_ref: (COUT, K) = (8, 36) bf16 BN-folded conv weights
    # b_ref: (COUT, 1)           f32 BN-folded bias (sublane values)
    # o_ref: (COUT, Q) = (8, 128) f32 pooled+activated output (one vreg)
    y = jnp.dot(w_ref[...], p_ref[...],
                preferred_element_type=jnp.float32)            # (8, 512) f32
    # MaxPool2d(2): the four 128-lane quarters are the (dh, dw) pool taps for
    # the same (n, hp, wp); pure VPU maxes over whole vregs, no relayout.
    pooled = jnp.maximum(jnp.maximum(y[:, 0:Q], y[:, Q:2 * Q]),
                         jnp.maximum(y[:, 2 * Q:3 * Q], y[:, 3 * Q:4 * Q]))
    # bias + ReLU after the max is exact (bias constant within each window).
    o_ref[...] = jnp.maximum(pooled + b_ref[...], 0.0)


@jax.jit
def cnn_block(x_nchw, w_oihw, b, gamma, beta, mean, var):
    # ---- fold BatchNorm2d(eval) + conv bias into the conv weights ----
    scale = gamma * jax.lax.rsqrt(var + EPS)                   # (COUT,)
    w_folded = w_oihw * scale[:, None, None, None]             # (COUT,CIN,KH,KW)
    b_folded = (b - mean) * scale + beta                       # (COUT,)
    # weight rows ordered c, cols ordered (kh, kw, cin) -- must match P rows.
    w_mat = jnp.transpose(w_folded, (0, 2, 3, 1)).reshape(COUT, K)
    w_mat = w_mat.astype(jnp.bfloat16)
    b_col = b_folded.reshape(COUT, 1).astype(jnp.float32)

    # ---- wrapper-side im2col, fused with the relayout + 'same' pad ----
    x = jnp.transpose(x_nchw, (0, 2, 3, 1))                    # NHWC
    xpad = jnp.pad(x, ((0, 0), (PH, PH), (PW, PW), (0, 0)))    # (N,18,18,CIN)
    cols = [xpad[:, kh:kh + H, kw:kw + W, :]                   # (N,H,W,CIN)
            for kh in range(KH) for kw in range(KW)]
    patches = jnp.stack(cols, axis=0)                          # (9,N,H,W,CIN)
    patches = patches.reshape(KH * KW, N, HP, 2, WP, 2, CIN)   # split h,w into (hp,dh),(wp,dw)
    # rows: (kk, cin); lanes: (dh, dw, n, hp, wp) -> pooling taps are quarters.
    p_mat = jnp.transpose(patches, (0, 6, 3, 5, 1, 2, 4)).reshape(K, S)
    p_mat = p_mat.astype(jnp.bfloat16)

    out = pl.pallas_call(
        cnn_block_kernel,
        out_shape=jax.ShapeDtypeStruct((COUT, Q), jnp.float32),
        in_specs=[
            pl.BlockSpec(memory_space=pltpu.MemorySpace.VMEM),
            pl.BlockSpec(memory_space=pltpu.MemorySpace.VMEM),
            pl.BlockSpec(memory_space=pltpu.MemorySpace.VMEM),
        ],
        out_specs=pl.BlockSpec(memory_space=pltpu.MemorySpace.VMEM),
        cost_estimate=pl.CostEstimate(
            flops=2 * S * K * COUT,
            transcendentals=0,
            bytes_accessed=K * S * 2 + COUT * K * 2 + COUT * 4 + COUT * Q * 4),
    )(p_mat, w_mat, b_col)

    # channel-major (COUT, N, HP*WP) -> NCHW flatten (N, COUT*HP*WP): 4 KB
    # permute, fused by XLA (explicitly allowed by the perf review).
    return out.reshape(COUT, N, HP * WP).transpose(1, 0, 2).reshape(N, COUT * HP * WP)


def reference(x_nchw, w_oihw, b, gamma, beta, mean, var):
    y = jax.lax.conv_general_dilated(
        x_nchw, w_oihw, window_strides=(1, 1), padding="SAME",
        dimension_numbers=("NCHW", "OIHW", "NCHW"),
        precision=jax.lax.Precision.HIGHEST)
    y = y + b[None, :, None, None]
    y = (y - mean[None, :, None, None]) * (
        gamma[None, :, None, None] *
        jax.lax.rsqrt(var[None, :, None, None] + EPS)) + beta[None, :, None, None]
    y = jnp.maximum(y, 0.0)
    y = y.reshape(N, COUT, HP, 2, WP, 2).max(axis=(3, 5))
    return y.reshape(N, -1)


if __name__ == "__main__":
    key = jax.random.PRNGKey(0)
    ks = jax.random.split(key, 7)
    x = jax.random.normal(ks[0], (N, CIN, H, W), jnp.float32)
    w = 0.1 * jax.random.normal(ks[1], (COUT, CIN, KH, KW), jnp.float32)
    b = 0.1 * jax.random.normal(ks[2], (COUT,), jnp.float32)
    gamma = 1.0 + 0.1 * jax.random.normal(ks[3], (COUT,), jnp.float32)
    beta = 0.1 * jax.random.normal(ks[4], (COUT,), jnp.float32)
    mean = 0.1 * jax.random.normal(ks[5], (COUT,), jnp.float32)
    var = jnp.abs(jax.random.normal(ks[6], (COUT,), jnp.float32)) + 0.5

    out = jax.block_until_ready(cnn_block(x, w, b, gamma, beta, mean, var))
    ref = reference(x, w, b, gamma, beta, mean, var)
    assert out.shape == (N, COUT * HP * WP)
    # bf16 MXU operands (same truncation the default-precision path applies):
    # ~1e-3 relative error vs the HIGHEST-precision reference is intentional.
    np.testing.assert_allclose(np.asarray(out), np.asarray(ref),
                               rtol=1e-2, atol=1e-2)
    print("KERNEL_OK")
</pallas_src>

<mosaic_0001>
module attributes {stable_mosaic.version = 11 : i64} {
  func.func @cnn_block_kernel(%arg0: memref<36x512xbf16, #tpu.memory_space<vmem>>, %arg1: memref<8x36xbf16, #tpu.memory_space<vmem>>, %arg2: memref<8x1xf32, #tpu.memory_space<vmem>>, %arg3: memref<8x128xf32, #tpu.memory_space<vmem>>) attributes {dimension_semantics = [], scalar_prefetch = 0 : i64, scratch_operands = 0 : i64, tpu.core_type = #tpu.core_type<tc>} {
    %c0 = arith.constant 0 : index
    %c0_0 = arith.constant 0 : index
    %0 = vector.load %arg1[%c0, %c0_0] : memref<8x36xbf16, #tpu.memory_space<vmem>>, vector<8x36xbf16>
    %c0_1 = arith.constant 0 : index
    %c0_2 = arith.constant 0 : index
    %1 = vector.load %arg0[%c0_1, %c0_2] : memref<36x512xbf16, #tpu.memory_space<vmem>>, vector<36x512xbf16>
    %cst = arith.constant dense<0.000000e+00> : vector<8x512xf32>
    %2 = tpu.matmul %0, %1, %cst {dimension_numbers = #tpu.dot_dimension_numbers<[1], [0], [0], [1], [0, 0, 1, 1], [], []>} : vector<8x36xbf16>, vector<36x512xbf16>, vector<8x512xf32> -> vector<8x512xf32>
    %3 = vector.extract_strided_slice %2 {offsets = [0, 0], sizes = [8, 128], strides = [1, 1]} : vector<8x512xf32> to vector<8x128xf32>
    %4 = vector.extract_strided_slice %2 {offsets = [0, 128], sizes = [8, 128], strides = [1, 1]} : vector<8x512xf32> to vector<8x128xf32>
    %5 = arith.maximumf %3, %4 : vector<8x128xf32>
    %6 = vector.extract_strided_slice %2 {offsets = [0, 256], sizes = [8, 128], strides = [1, 1]} : vector<8x512xf32> to vector<8x128xf32>
    %7 = vector.extract_strided_slice %2 {offsets = [0, 384], sizes = [8, 128], strides = [1, 1]} : vector<8x512xf32> to vector<8x128xf32>
    %8 = arith.maximumf %6, %7 : vector<8x128xf32>
    %9 = arith.maximumf %5, %8 : vector<8x128xf32>
    %c0_3 = arith.constant 0 : index
    %c0_4 = arith.constant 0 : index
    %10 = vector.load %arg2[%c0_3, %c0_4] : memref<8x1xf32, #tpu.memory_space<vmem>>, vector<8x1xf32>
    %11 = vector.broadcast %10 : vector<8x1xf32> to vector<8x128xf32>
    %12 = arith.addf %9, %11 : vector<8x128xf32>
    %cst_5 = arith.constant 0.000000e+00 : f32
    %13 = vector.broadcast %cst_5 : f32 to vector<8x128xf32>
    %14 = arith.maximumf %12, %13 : vector<8x128xf32>
    %c0_6 = arith.constant 0 : index
    %c0_7 = arith.constant 0 : index
    %15 = vector.load %arg3[%c0_6, %c0_7] : memref<8x128xf32, #tpu.memory_space<vmem>>, vector<8x128xf32>
    tpu.vector_store %arg3[%c0_6, %c0_7], %14 {strides = array<i32>} : memref<8x128xf32, #tpu.memory_space<vmem>>, vector<8x128xf32>,
    return
  }
}

</mosaic_0001>

<bundles_post_ra>
// kernel: cnn_block.1
= control target key start
LH: loop header
LB: loop body
LE: loop exit
PB: predicated region body
PF: predicated region fallthrough
CT: control target
= control target key end

     0   :  { %vm80_vm0 = vcmask 1041408   ;;  %v225_v2 = vmov 0   ;;  %vm76_vm1 = vcmask 293888   ;;  %s285_s0 = inlined_call_operand.vmem [shape: bf16[36,512], index: 0, kind: input, shape index: {}]   ;;  %s286_s2 = inlined_call_operand.vmem [shape: f32[8,1], index: 2, kind: input, shape index: {}]   ;;  %s287_s1 = inlined_call_operand.vmem [shape: bf16[8,36], index: 1, kind: input, shape index: {}]   ;;  %s288_s3 = inlined_call_operand.vmem [shape: f32[8,128], index: 3, kind: output, shape index: {}]  }
   0x1   :  { %v24_v0 = vld [vmem:[%s285_s0 + $0x40] sm:$0x33]  ;;  %v25_v1 = vld [vmem:[%s285_s0 + $0x48] sm:$0x33]  ;;  %125 = vmatprep.mubr.bf16.mxu0 %v225_v2  ;;  %166 = vmatprep.mubr.bf16.mxu1 %v225_v2 }
   0x2   :  { %v200_v3 = vcombine.high %v24_v0, %v24_v0  ;;  %v202_v4 = vcombine.high %v25_v1, %v25_v1  ;;  %v199_v5 = vcombine.low %v24_v0, %v24_v0  ;;  %v201_v6 = vcombine.low %v25_v1, %v25_v1  ;;  %v213_v7 = vld [vmem:[%s285_s0 + $0x24] ss:$16 sps:$4 sm:$0xff]   ;;  %208 = vset.pattern.permute.xlu0 %v225_v2  ;;  %v215_v8 = vld [vmem:[%s285_s0 + $0x2c] ss:$16 sps:$4 sm:$0xff]   ;;  %v217_v11 = vld [vmem:[%s285_s0 + $0x20] ss:$16 sps:$4 sm:$0xff]  }
   0x3   :  { %v218_v12 = vld [vmem:[%s285_s0 + $0x28] ss:$16 sps:$4 sm:$0xff]   ;;  %v219_v13 = vld [vmem:[%s285_s0 + $0x4] ss:$16 sps:$4 sm:$0xff]   ;;  %v221_v14 = vld [vmem:[%s285_s0 + $0xc] ss:$16 sps:$4 sm:$0xff]  }
   0x4   :  { %203 = vmatprep.subr.msk.bf16.mxu0 %vm80_vm0, %v200_v3  ;;  %205 = vmatprep.subr.msk.bf16.mxu1 %vm80_vm0, %v202_v4  ;;  %v82_v9 = vsel %vm80_vm0, %v199_v5, 0  ;;  %v88_v10 = vsel %vm80_vm0, %v201_v6, 0  ;;  %v178_v15 = vld [vmem:[%s286_s2] sm:$0xff]  ;;  %v224_v17 = vld [vmem:[%s285_s0 + $0x8] ss:$16 sps:$4 sm:$0xff]  }
   0x5   :  { %104 = vmatpush1.bf16.msra.mxu0 %v82_v9  ;;  %145 = vmatpush1.bf16.msra.mxu1 %v88_v10  ;;  %v223_v16 = vld [vmem:[%s285_s0] ss:$16 sps:$4 sm:$0xff]  }
   0x6   :  { %105 = vmatprep.subr.bf16.mxu0 %v213_v7  ;;  %146 = vmatprep.subr.bf16.mxu1 %v215_v8  ;;  %v15_v18 = vld [vmem:[%s287_s1] sm:$0xf] }
   0x7   :  { %181 = vperm.xlu0 %208, %v178_v15  }
   0x9   :  { %106 = vmatpush1.bf16.msra.mxu0 %v217_v11  ;;  %147 = vmatpush1.bf16.msra.mxu1 %v218_v12 }
   0xa   :  { %107 = vmatprep.subr.bf16.mxu0 %v219_v13  ;;  %148 = vmatprep.subr.bf16.mxu1 %v221_v14 }
   0xd   :  { %108 = vmatpush1.bf16.msra.mxu0 %v223_v16  ;;  %149 = vmatpush1.bf16.msra.mxu1 %v224_v17 }
  0x10   :  { %204 = vmatmul.mubr.msk.bf16.vlgmr.msra.gmra.mxu0 %vm76_vm1, %v15_v18  ;;  %206 = vmatmul.mubr.msk.bf16.vlgmr.msra.gmra.mxu1 %vm76_vm1, %v15_v18 }
  0x82   :  { %v182_v25 = vpop.permute.xlu0 %181 }
  0xd0   :  { %v127_v19 = vpop.f32.mrf.mxu0  ;;  %v168_v20 = vpop.f32.mrf.mxu1 }
  0xd2   :  { %v129_v21 = vpop.f32.mrf.mxu0  ;;  %v170_v22 = vpop.f32.mrf.mxu1 }
  0xd3   :  { %v175_v23 = vmax.f32 %v127_v19, %v129_v21  ;;  %v176_v24 = vmax.f32 %v168_v20, %v170_v22 }
  0xd4   :  { %v131_v26 = vpop.f32.mrf.mxu0  ;;  %v172_v27 = vpop.f32.mrf.mxu1 }
  0xd5   :  { %v177_v28 = vmax.f32 %v175_v23, %v176_v24 }
  0xd6   :  { %v132_v29 = vpop.f32.mrf.mxu0  ;;  %v173_v30 = vpop.f32.mrf.mxu1 }
  0xd7   :  { %v184_v31 = vadd.f32 %v182_v25, %v177_v28 }
  0xd9   :  { %v185_v32 = vmax.f32 %v184_v31, 0.0 }
  0xdb   :  { %186 = vst [vmem:[%s288_s3] sm:$0xff] %v185_v32 }

</bundles_post_ra>
